<compile_context>
chip_gen: v7x
topology: tpu7x:2x2x1
jax: 0.10.0
libtpu: 0.0.40
codegen_flags: <defaults>
</compile_context>

<pallas_src>
import functools

import jax
import jax.numpy as jnp
from jax import lax
from jax.experimental import pallas as pl
from jax.experimental.pallas import tpu as pltpu


def mha_kernel(x_ref, wqkv_ref, bqkv_ref, o_ref, *, head_num, q_tile,
               compute_dtype):
    """One grid step = (one batch element, one query tile)."""
    x = x_ref[0]                                    # (seq, hidden)
    seq, hidden = x.shape
    dh = hidden // head_num
    scale = jnp.float32(1.0 / (dh ** 0.5))
    qi = pl.program_id(1)

    # Fused Q/K/V projection: a single MXU matmul with 3*hidden output columns.
    qkv = jnp.dot(x.astype(compute_dtype),
                  wqkv_ref[...].astype(compute_dtype),
                  preferred_element_type=jnp.float32) + bqkv_ref[0]

    if q_tile == seq:                               # single query tile
        q_rows = qkv
    else:
        # TODO(synk): for very long sequences, split into a QKV pass and a
        # flash-style (online-softmax) attention pass so the projection is not
        # recomputed per query tile.
        start = pl.multiple_of(qi * q_tile, q_tile)
        q_rows = lax.dynamic_slice(qkv, (start, 0), (q_tile, 3 * hidden))

    k_all = qkv[:, hidden:2 * hidden]               # (seq, hidden)
    v_all = qkv[:, 2 * hidden:3 * hidden]           # (seq, hidden)

    outs = []
    for h in range(head_num):                       # head_num: small, static
        lo = h * dh
        qh = q_rows[:, lo:lo + dh].astype(compute_dtype)     # (q_tile, dh)
        kh = k_all[:, lo:lo + dh].astype(compute_dtype)      # (seq, dh)
        vh = v_all[:, lo:lo + dh].astype(compute_dtype)      # (seq, dh)

        # q @ k^T expressed as a contraction on the last dims: no transpose.
        s = lax.dot_general(qh, kh, (((1,), (1,)), ((), ())),
                            preferred_element_type=jnp.float32) * scale

        # Numerically-stable softmax, kept in f32 on the VPU/EUP.
        s = s - jnp.max(s, axis=-1, keepdims=True)
        e = jnp.exp(s)
        p = e * pl.reciprocal(jnp.sum(e, axis=-1, keepdims=True), approx=False)

        outs.append(jnp.dot(p.astype(compute_dtype), vh,
                            preferred_element_type=jnp.float32))

    # One lane-dense, full-width store of all heads at once.
    o_ref[0] = jnp.concatenate(outs, axis=-1).astype(o_ref.dtype)


def multi_head_attention(x, wq, bq, wk, bk, wv, bv, head_num, *, q_tile=None):
    batch, seq_len, hidden = x.shape
    assert hidden % head_num == 0

    # Fuse the three projections into a single (hidden, 3*hidden) weight and a
    # (1, 3*hidden) bias (nn.Linear is y = x @ W^T + b; wq/wk/wv are already
    # the right-multiplication matrices).
    wqkv = jnp.concatenate([wq, wk, wv], axis=1)
    bqkv = jnp.concatenate([bq, bk, bv], axis=0).reshape(1, 3 * hidden)

    # Query-tile size: full seq for short sequences, else a 128..512 tile.
    if q_tile is None:
        q_tile = seq_len
        for t in (512, 256, 128):
            if seq_len % t == 0:
                q_tile = t
                break
    assert seq_len % q_tile == 0
    n_q = seq_len // q_tile

    # bf16 MXU operands only if the model is already bf16; f32 otherwise.
    compute_dtype = jnp.bfloat16 if x.dtype == jnp.bfloat16 else jnp.float32

    kernel = functools.partial(mha_kernel, head_num=head_num, q_tile=q_tile,
                               compute_dtype=compute_dtype)

    x_spec = pl.BlockSpec((1, seq_len, hidden), lambda b, qi: (b, 0, 0))
    w_spec = pl.BlockSpec((hidden, 3 * hidden), lambda b, qi: (0, 0))
    b_spec = pl.BlockSpec((1, 3 * hidden), lambda b, qi: (0, 0))
    o_spec = pl.BlockSpec((1, q_tile, hidden), lambda b, qi: (b, qi, 0))

    # VMEM budget: pipelined x/out blocks + resident fused weight + f32 temps.
    itemsize = jnp.dtype(x.dtype).itemsize
    working_set = (
        2 * seq_len * hidden * itemsize           # x block (double-buffered)
        + 2 * q_tile * hidden * itemsize          # out block (double-buffered)
        + hidden * 3 * hidden * itemsize          # fused QKV weight
        + seq_len * 3 * hidden * 4                # qkv activations (f32)
        + 3 * q_tile * seq_len * 4                # per-head score temporaries
        + 2 * q_tile * hidden * 4                 # per-head outputs pre-concat
    )
    vmem_limit = int(min(max(3 * working_set, 32 * 1024 * 1024),
                         64 * 1024 * 1024))

    return pl.pallas_call(
        kernel,
        out_shape=jax.ShapeDtypeStruct((batch, seq_len, hidden), x.dtype),
        grid_spec=pltpu.PrefetchScalarGridSpec(
            num_scalar_prefetch=0,
            grid=(batch, n_q),
            in_specs=[x_spec, w_spec, b_spec],
            out_specs=o_spec,
        ),
        compiler_params=pltpu.CompilerParams(
            dimension_semantics=("parallel", "parallel"),
            vmem_limit_bytes=vmem_limit,
        ),
    )(x, wqkv, bqkv)


def reference_mha(x, wq, bq, wk, bk, wv, bv, head_num):
    """Pure-JAX reference mirroring the PyTorch forward."""
    batch, seq_len, hidden = x.shape
    dh = hidden // head_num
    q = x @ wq + bq
    k = x @ wk + bk
    v = x @ wv + bv
    q = q.reshape(batch, seq_len, head_num, dh).transpose(0, 2, 1, 3)
    k = k.reshape(batch, seq_len, head_num, dh).transpose(0, 2, 1, 3)
    v = v.reshape(batch, seq_len, head_num, dh).transpose(0, 2, 1, 3)
    s = (q @ jnp.swapaxes(k, -1, -2)) / jnp.sqrt(jnp.float32(dh))
    p = jax.nn.softmax(s, axis=-1)
    att = p @ v
    return att.transpose(0, 2, 1, 3).reshape(batch, seq_len, hidden)


if __name__ == "__main__":
    batch, seq_len, hidden, head_num = 2, 8, 32, 4

    key = jax.random.PRNGKey(0)
    kx, kq, kk, kv, kbq, kbk, kbv = jax.random.split(key, 7)

    x = jax.random.normal(kx, (batch, seq_len, hidden), dtype=jnp.float32)
    # nn.Linear(hidden, hidden): y = x @ W^T + b.  Generate W^T directly.
    init = 1.0 / jnp.sqrt(jnp.float32(hidden))
    wq = jax.random.uniform(kq, (hidden, hidden), jnp.float32, -init, init)
    wk = jax.random.uniform(kk, (hidden, hidden), jnp.float32, -init, init)
    wv = jax.random.uniform(kv, (hidden, hidden), jnp.float32, -init, init)
    bq = jax.random.uniform(kbq, (hidden,), jnp.float32, -init, init)
    bk = jax.random.uniform(kbk, (hidden,), jnp.float32, -init, init)
    bv = jax.random.uniform(kbv, (hidden,), jnp.float32, -init, init)

    out = multi_head_attention(x, wq, bq, wk, bk, wv, bv, head_num)
    out = jax.block_until_ready(out)

    ref = reference_mha(x, wq, bq, wk, bk, wv, bv, head_num)
    assert out.shape == (batch, seq_len, hidden)
    assert jnp.allclose(out, ref, atol=1e-4, rtol=1e-4), "mismatch vs reference"

    print("KERNEL_OK")
</pallas_src>

<mosaic_0001>
module attributes {stable_mosaic.version = 11 : i64} {
  func.func @mha_kernel(%arg0: i32, %arg1: i32, %arg2: memref<1x8x32xf32, #tpu.memory_space<vmem>>, %arg3: memref<32x96xf32, #tpu.memory_space<vmem>>, %arg4: memref<1x96xf32, #tpu.memory_space<vmem>>, %arg5: memref<1x8x32xf32, #tpu.memory_space<vmem>>) attributes {dimension_semantics = [#tpu.dimension_semantics<parallel>, #tpu.dimension_semantics<parallel>], iteration_bounds = array<i64: 2, 1>, scalar_prefetch = 0 : i64, scratch_operands = 0 : i64, tpu.core_type = #tpu.core_type<tc>, window_params = [{transform_indices = @transform_0, window_bounds = array<i64: 1, 8, 32>}, {pipeline_mode = #tpu.pipeline_mode<synchronous>, transform_indices = @transform_1, window_bounds = array<i64: 32, 96>}, {pipeline_mode = #tpu.pipeline_mode<synchronous>, transform_indices = @transform_2, window_bounds = array<i64: 1, 96>}, {transform_indices = @transform_3, window_bounds = array<i64: 1, 8, 32>}]} {
    %c0 = arith.constant 0 : index
    %c0_0 = arith.constant 0 : index
    %c0_1 = arith.constant 0 : index
    %0 = vector.load %arg2[%c0, %c0_0, %c0_1] : memref<1x8x32xf32, #tpu.memory_space<vmem>>, vector<1x8x32xf32>
    %1 = vector.shape_cast %0 : vector<1x8x32xf32> to vector<8x32xf32>
    %c0_2 = arith.constant 0 : index
    %c0_3 = arith.constant 0 : index
    %2 = vector.load %arg3[%c0_2, %c0_3] : memref<32x96xf32, #tpu.memory_space<vmem>>, vector<32x96xf32>
    %cst = arith.constant dense<0.000000e+00> : vector<8x96xf32>
    %3 = tpu.matmul %1, %2, %cst {dimension_numbers = #tpu.dot_dimension_numbers<[1], [0], [0], [1], [0, 0, 1, 1], [], []>} : vector<8x32xf32>, vector<32x96xf32>, vector<8x96xf32> -> vector<8x96xf32>
    %c0_4 = arith.constant 0 : index
    %c0_5 = arith.constant 0 : index
    %4 = vector.load %arg4[%c0_4, %c0_5] : memref<1x96xf32, #tpu.memory_space<vmem>>, vector<1x96xf32>
    %5 = vector.shape_cast %4 : vector<1x96xf32> to vector<96xf32>
    %6 = vector.shape_cast %5 : vector<96xf32> to vector<1x96xf32>
    %7 = vector.broadcast %6 : vector<1x96xf32> to vector<8x96xf32>
    %8 = arith.addf %3, %7 : vector<8x96xf32>
    %9 = vector.extract_strided_slice %8 {offsets = [0, 32], sizes = [8, 32], strides = [1, 1]} : vector<8x96xf32> to vector<8x32xf32>
    %10 = vector.extract_strided_slice %8 {offsets = [0, 64], sizes = [8, 32], strides = [1, 1]} : vector<8x96xf32> to vector<8x32xf32>
    %11 = vector.extract_strided_slice %8 {offsets = [0, 0], sizes = [8, 8], strides = [1, 1]} : vector<8x96xf32> to vector<8x8xf32>
    %12 = vector.extract_strided_slice %9 {offsets = [0, 0], sizes = [8, 8], strides = [1, 1]} : vector<8x32xf32> to vector<8x8xf32>
    %13 = vector.extract_strided_slice %10 {offsets = [0, 0], sizes = [8, 8], strides = [1, 1]} : vector<8x32xf32> to vector<8x8xf32>
    %cst_6 = arith.constant dense<0.000000e+00> : vector<8x8xf32>
    %14 = tpu.matmul %11, %12, %cst_6 {dimension_numbers = #tpu.dot_dimension_numbers<[1], [1], [0], [0], [0, 0, 1, 0], [], []>} : vector<8x8xf32>, vector<8x8xf32>, vector<8x8xf32> -> vector<8x8xf32>
    %cst_7 = arith.constant 0.353553385 : f32
    %15 = vector.broadcast %cst_7 : f32 to vector<8x8xf32>
    %16 = arith.mulf %14, %15 : vector<8x8xf32>
    %cst_8 = arith.constant dense<0xFF800000> : vector<8xf32>
    %17 = vector.multi_reduction <maximumf>, %16, %cst_8 [1] : vector<8x8xf32> to vector<8xf32>
    %18 = vector.shape_cast %17 : vector<8xf32> to vector<8x1xf32>
    %19 = vector.broadcast %18 : vector<8x1xf32> to vector<8x8xf32>
    %20 = arith.subf %16, %19 : vector<8x8xf32>
    %21 = math.exp %20 : vector<8x8xf32>
    %cst_9 = arith.constant dense<0.000000e+00> : vector<8xf32>
    %22 = vector.multi_reduction <add>, %21, %cst_9 [1] : vector<8x8xf32> to vector<8xf32>
    %23 = vector.shape_cast %22 : vector<8xf32> to vector<8x1xf32>
    %24 = tpu.reciprocal %23 : vector<8x1xf32> -> vector<8x1xf32>
    %25 = vector.broadcast %24 : vector<8x1xf32> to vector<8x8xf32>
    %26 = arith.mulf %21, %25 : vector<8x8xf32>
    %cst_10 = arith.constant dense<0.000000e+00> : vector<8x8xf32>
    %27 = tpu.matmul %26, %13, %cst_10 {dimension_numbers = #tpu.dot_dimension_numbers<[1], [0], [0], [1], [0, 0, 1, 1], [], []>} : vector<8x8xf32>, vector<8x8xf32>, vector<8x8xf32> -> vector<8x8xf32>
    %28 = vector.extract_strided_slice %8 {offsets = [0, 8], sizes = [8, 8], strides = [1, 1]} : vector<8x96xf32> to vector<8x8xf32>
    %29 = vector.extract_strided_slice %9 {offsets = [0, 8], sizes = [8, 8], strides = [1, 1]} : vector<8x32xf32> to vector<8x8xf32>
    %30 = vector.extract_strided_slice %10 {offsets = [0, 8], sizes = [8, 8], strides = [1, 1]} : vector<8x32xf32> to vector<8x8xf32>
    %cst_11 = arith.constant dense<0.000000e+00> : vector<8x8xf32>
    %31 = tpu.matmul %28, %29, %cst_11 {dimension_numbers = #tpu.dot_dimension_numbers<[1], [1], [0], [0], [0, 0, 1, 0], [], []>} : vector<8x8xf32>, vector<8x8xf32>, vector<8x8xf32> -> vector<8x8xf32>
    %cst_12 = arith.constant 0.353553385 : f32
    %32 = vector.broadcast %cst_12 : f32 to vector<8x8xf32>
    %33 = arith.mulf %31, %32 : vector<8x8xf32>
    %cst_13 = arith.constant dense<0xFF800000> : vector<8xf32>
    %34 = vector.multi_reduction <maximumf>, %33, %cst_13 [1] : vector<8x8xf32> to vector<8xf32>
    %35 = vector.shape_cast %34 : vector<8xf32> to vector<8x1xf32>
    %36 = vector.broadcast %35 : vector<8x1xf32> to vector<8x8xf32>
    %37 = arith.subf %33, %36 : vector<8x8xf32>
    %38 = math.exp %37 : vector<8x8xf32>
    %cst_14 = arith.constant dense<0.000000e+00> : vector<8xf32>
    %39 = vector.multi_reduction <add>, %38, %cst_14 [1] : vector<8x8xf32> to vector<8xf32>
    %40 = vector.shape_cast %39 : vector<8xf32> to vector<8x1xf32>
    %41 = tpu.reciprocal %40 : vector<8x1xf32> -> vector<8x1xf32>
    %42 = vector.broadcast %41 : vector<8x1xf32> to vector<8x8xf32>
    %43 = arith.mulf %38, %42 : vector<8x8xf32>
    %cst_15 = arith.constant dense<0.000000e+00> : vector<8x8xf32>
    %44 = tpu.matmul %43, %30, %cst_15 {dimension_numbers = #tpu.dot_dimension_numbers<[1], [0], [0], [1], [0, 0, 1, 1], [], []>} : vector<8x8xf32>, vector<8x8xf32>, vector<8x8xf32> -> vector<8x8xf32>
    %45 = vector.extract_strided_slice %8 {offsets = [0, 16], sizes = [8, 8], strides = [1, 1]} : vector<8x96xf32> to vector<8x8xf32>
    %46 = vector.extract_strided_slice %9 {offsets = [0, 16], sizes = [8, 8], strides = [1, 1]} : vector<8x32xf32> to vector<8x8xf32>
    %47 = vector.extract_strided_slice %10 {offsets = [0, 16], sizes = [8, 8], strides = [1, 1]} : vector<8x32xf32> to vector<8x8xf32>
    %cst_16 = arith.constant dense<0.000000e+00> : vector<8x8xf32>
    %48 = tpu.matmul %45, %46, %cst_16 {dimension_numbers = #tpu.dot_dimension_numbers<[1], [1], [0], [0], [0, 0, 1, 0], [], []>} : vector<8x8xf32>, vector<8x8xf32>, vector<8x8xf32> -> vector<8x8xf32>
    %cst_17 = arith.constant 0.353553385 : f32
    %49 = vector.broadcast %cst_17 : f32 to vector<8x8xf32>
    %50 = arith.mulf %48, %49 : vector<8x8xf32>
    %cst_18 = arith.constant dense<0xFF800000> : vector<8xf32>
    %51 = vector.multi_reduction <maximumf>, %50, %cst_18 [1] : vector<8x8xf32> to vector<8xf32>
    %52 = vector.shape_cast %51 : vector<8xf32> to vector<8x1xf32>
    %53 = vector.broadcast %52 : vector<8x1xf32> to vector<8x8xf32>
    %54 = arith.subf %50, %53 : vector<8x8xf32>
    %55 = math.exp %54 : vector<8x8xf32>
    %cst_19 = arith.constant dense<0.000000e+00> : vector<8xf32>
    %56 = vector.multi_reduction <add>, %55, %cst_19 [1] : vector<8x8xf32> to vector<8xf32>
    %57 = vector.shape_cast %56 : vector<8xf32> to vector<8x1xf32>
    %58 = tpu.reciprocal %57 : vector<8x1xf32> -> vector<8x1xf32>
    %59 = vector.broadcast %58 : vector<8x1xf32> to vector<8x8xf32>
    %60 = arith.mulf %55, %59 : vector<8x8xf32>
    %cst_20 = arith.constant dense<0.000000e+00> : vector<8x8xf32>
    %61 = tpu.matmul %60, %47, %cst_20 {dimension_numbers = #tpu.dot_dimension_numbers<[1], [0], [0], [1], [0, 0, 1, 1], [], []>} : vector<8x8xf32>, vector<8x8xf32>, vector<8x8xf32> -> vector<8x8xf32>
    %62 = vector.extract_strided_slice %8 {offsets = [0, 24], sizes = [8, 8], strides = [1, 1]} : vector<8x96xf32> to vector<8x8xf32>
    %63 = vector.extract_strided_slice %9 {offsets = [0, 24], sizes = [8, 8], strides = [1, 1]} : vector<8x32xf32> to vector<8x8xf32>
    %64 = vector.extract_strided_slice %10 {offsets = [0, 24], sizes = [8, 8], strides = [1, 1]} : vector<8x32xf32> to vector<8x8xf32>
    %cst_21 = arith.constant dense<0.000000e+00> : vector<8x8xf32>
    %65 = tpu.matmul %62, %63, %cst_21 {dimension_numbers = #tpu.dot_dimension_numbers<[1], [1], [0], [0], [0, 0, 1, 0], [], []>} : vector<8x8xf32>, vector<8x8xf32>, vector<8x8xf32> -> vector<8x8xf32>
    %cst_22 = arith.constant 0.353553385 : f32
    %66 = vector.broadcast %cst_22 : f32 to vector<8x8xf32>
    %67 = arith.mulf %65, %66 : vector<8x8xf32>
    %cst_23 = arith.constant dense<0xFF800000> : vector<8xf32>
    %68 = vector.multi_reduction <maximumf>, %67, %cst_23 [1] : vector<8x8xf32> to vector<8xf32>
    %69 = vector.shape_cast %68 : vector<8xf32> to vector<8x1xf32>
    %70 = vector.broadcast %69 : vector<8x1xf32> to vector<8x8xf32>
    %71 = arith.subf %67, %70 : vector<8x8xf32>
    %72 = math.exp %71 : vector<8x8xf32>
    %cst_24 = arith.constant dense<0.000000e+00> : vector<8xf32>
    %73 = vector.multi_reduction <add>, %72, %cst_24 [1] : vector<8x8xf32> to vector<8xf32>
    %74 = vector.shape_cast %73 : vector<8xf32> to vector<8x1xf32>
    %75 = tpu.reciprocal %74 : vector<8x1xf32> -> vector<8x1xf32>
    %76 = vector.broadcast %75 : vector<8x1xf32> to vector<8x8xf32>
    %77 = arith.mulf %72, %76 : vector<8x8xf32>
    %cst_25 = arith.constant dense<0.000000e+00> : vector<8x8xf32>
    %78 = tpu.matmul %77, %64, %cst_25 {dimension_numbers = #tpu.dot_dimension_numbers<[1], [0], [0], [1], [0, 0, 1, 1], [], []>} : vector<8x8xf32>, vector<8x8xf32>, vector<8x8xf32> -> vector<8x8xf32>
    %79 = tpu.concatenate %27, %44, %61, %78 in 1 : vector<8x8xf32>, vector<8x8xf32>, vector<8x8xf32>, vector<8x8xf32> -> vector<8x32xf32>
    %c0_26 = arith.constant 0 : index
    %c0_27 = arith.constant 0 : index
    %c0_28 = arith.constant 0 : index
    %80 = vector.load %arg5[%c0_26, %c0_27, %c0_28] : memref<1x8x32xf32, #tpu.memory_space<vmem>>, vector<1x8x32xf32>
    %81 = vector.shape_cast %80 : vector<1x8x32xf32> to vector<8x32xf32>
    %82 = vector.shape_cast %79 : vector<8x32xf32> to vector<1x8x32xf32>
    tpu.vector_store %arg5[%c0_26, %c0_27, %c0_28], %82 {strides = array<i32>} : memref<1x8x32xf32, #tpu.memory_space<vmem>>, vector<1x8x32xf32>,
    return
  }
  func.func @transform_0(%arg0: i32, %arg1: i32) -> (i32, i32, i32) {
    %c0_i32 = arith.constant 0 : i32
    %c0_i32_0 = arith.constant 0 : i32
    %c0_i32_1 = arith.constant 0 : i32
    return %arg0, %c0_i32, %c0_i32_0 : i32, i32, i32
  }
  func.func @transform_1(%arg0: i32, %arg1: i32) -> (i32, i32) {
    %c0_i32 = arith.constant 0 : i32
    %c0_i32_0 = arith.constant 0 : i32
    %c0_i32_1 = arith.constant 0 : i32
    return %c0_i32, %c0_i32_0 : i32, i32
  }
  func.func @transform_2(%arg0: i32, %arg1: i32) -> (i32, i32) {
    %c0_i32 = arith.constant 0 : i32
    %c0_i32_0 = arith.constant 0 : i32
    %c0_i32_1 = arith.constant 0 : i32
    return %c0_i32, %c0_i32_0 : i32, i32
  }
  func.func @transform_3(%arg0: i32, %arg1: i32) -> (i32, i32, i32) {
    %c0_i32 = arith.constant 0 : i32
    %c0_i32_0 = arith.constant 0 : i32
    return %arg0, %arg1, %c0_i32 : i32, i32, i32
  }
}

</mosaic_0001>

<bundles_post_ra>
// kernel: tpu_custom_call.1
= control target key start
LH: loop header
LB: loop body
LE: loop exit
PB: predicated region body
PF: predicated region fallthrough
CT: control target
= control target key end

     0   :  { %8 = vsyncpa [#allocation3], 0  ;;  %s1774_s0 = inlined_call_operand.hbm [shape: f32[2,8,32], index: 0, kind: input, shape index: {}]   ;;  %s1775_s1 = inlined_call_operand.hbm [shape: f32[32,96], index: 1, kind: input, shape index: {}]   ;;  %s1776_s2 = inlined_call_operand.vmem [shape: f32[1,96], index: 2, kind: input, shape index: {}]   ;;  %s1777_s3 = inlined_call_operand.hbm [shape: f32[2,8,32], index: 3, kind: output, shape index: {}]  }
   0x1   :  { %10 = vsyncpa [#allocation3 + $0x1], 0 }
   0x2   :  { %11 = vsyncpa [#allocation6], 0 }
   0x3   :  { %12 = vsyncpa [#allocation4], 0 }
   0x4   :  { %14 = vsyncpa [#allocation4 + $0x1], 0  ;;  %s1490_s12 = smov 0   ;;  %s1492_s13 = smov 0  }
   0x5   :  { %s1494_s14 = smov 0   ;;  %s1496_s15 = smov 0  }
   0x6   :  { %s1498_s16 = smov 0   ;;  %s1500_s17 = smov 0  }
   0x7 LB: > { %s1087_s18 = sadd.s32 4294967295, %s1446_s17   ;;  %s1088_s19 = sadd.s32 4294967294, %s1446_s17   ;;  %s1446_s17 = sphi %s1500_s17, %s20_s17   ;;  %s1442_s16 = sphi %s1498_s16, %s1801_s16   ;;  %s1438_s15 = sphi %s1496_s15, %s1800_s15   ;;  %s1434_s14 = sphi %s1494_s14, %s1799_s14   ;;  %s1430_s13 = sphi %s1492_s13, %s1798_s13   ;;  %s1426_s12 = sphi %s1490_s12, %s1797_s12  }
   0x8   : > { %p52_p0 = scmp.ne.s32.totalorder %s1430_s13, %s1426_s12  ;;  %p1524_p1 = scmp.eq.s32.totalorder %s1087_s18, 0 }
   0x9   : > { %p1528_p2 = scmp.eq.s32.totalorder %s1087_s18, 1  ;;  %p126_p3 = scmp.eq.s32.totalorder %s1088_s19, 1 }
   0xa   : > { %s1782_s20 = scalar_select %p1524_p1, 1, 0 }
   0xb   : > { %s1783_s21 = scalar_select %p1528_p2, 1, 0 }
   0xc   : > { %p1534_p4 = por %p1524_p1, %p52_p0  ;;  %p1089_p5 = scmp.ge.s32.totalorder %s1446_s17, 1 }
   0xd   : > { %p1539_p6 = por %p126_p3, %p52_p0  ;;  %p133_p7 = scmp.lt.s32.totalorder %s1446_s17, 3 }
   0xe   : > { %s1784_s22 = scalar_select %p1534_p4, 1, 0 }
   0xf   : > { %s1785_s23 = scalar_select %p1539_p6, 1, 0 }
  0x10   : > { %p1544_p8 = pnand %p1089_p5, %p133_p7  ;;  %s1448_s25 = smov [#allocation5]  }
  0x11   : > { %s145_s26 = sshll.u32 %s1448_s25, 4  ;;  %s32_s28 = sadd.s32 1, %s1442_s16  ;;  %s146_s26 = int_to_ptr.vmem [resolvable:$true] %s145_s26 }
  0x12   : > { %s1786_s24 = scalar_select %p1544_p8, 1, 0 }
  0x13   : > { %p1202_p9 = pneg %p1544_p8  ;;  %s1302_s4 = scalar_lea.hbm %s1775_s1, 512 }
  0x14   : > { %p1303_p12 = scmp.ne.s32.totalorder %s1775_s1, %s1302_s4  ;;  %p1309_p5 = scmp.lt.u32.totalorder %s1302_s4, %s1775_s1 }
  0x15   : > { %p1553_p11 = pnand %p1202_p9, %p1524_p1 }
  0x17   : > { %p1304_p13 = pneg %p1553_p11 }
  0x19   : > { %p1305_p0 = pnand %p1304_p13, %p1303_p12 }
  0x1b   : > { %p1306_p3 = pneg %p1305_p0 }
  0x1d   : > { %p1311_p7 = pnand %p1309_p5, %p1306_p3 }
  0x1f   : > { %1314 = shalt.err (!%p1311_p7)
}
  0x20   : > { %s1315_s9 = scalar_lea.vmem %s146_s26, 512  ;;  %p1323_p1 = scmp.lt.s32.totalorder %s146_s26, %s146_s26 }
  0x21   : > { %p1316_p9 = scmp.ne.s32.totalorder %s146_s26, %s1315_s9  ;;  %p1324_p4 = scmp.lt.s32.totalorder %s1315_s9, %s1315_s9 }
  0x23   : > { %p1318_p10 = pnand %p1316_p9, %p1304_p13  ;;  %p1325_p8 = por %p1324_p4, %p1323_p1 }
  0x25   : > { %p1319_p6 = pneg %p1318_p10 }
  0x27   : > { %p1326_p2 = pnand %p1325_p8, %p1319_p6 }
  0x29   : > { %1329 = shalt.err (!%p1326_p2)
}
  0x2a   : > { %s1449_s10 = smov 128   ;;  %s1450_s11 = smov 8  }
  0x2b   : > { %1205 = dma.hbm_to_vmem [thread:$0]  (!%p1553_p11), %s1775_s1, 512, %s146_s26, [#allocation6], %s1449_s10, %s1449_s10, %s1450_s11  }
  0x2c   : > { %p34_p1 = scmp.ge.s32.totalorder %s32_s28, 2  ;;  %s39_s25 = sadd.s32 1, %s1434_s14 }
  0x2d   : > { %p46_p2 = scmp.ne.s32.totalorder %s1434_s14, %s1430_s13  ;;  %p47_p4 = scmp.eq.s32.totalorder %s1446_s17, 0 }
  0x2e   : > { %s1803_s28 = smov (%p34_p1, %s32_s28), 0  ;;  %p1789_p8 = scmp.ne.s32.totalorder %s1783_s21, 0 }
  0x2f   : > { %p1580_p6 = por %p47_p4, %p46_p2  ;;  %s36_s27 = ssub.s32 %s1442_s16, %s1803_s28 }
  0x30   : > { %p1586_p10 = por %p1789_p8, %p46_p2  ;;  %p1215_p12 = scmp.lt.s32.totalorder %s1446_s17, 2 }
  0x31   : > { %p37_p11 = scmp.eq.s32.totalorder %s36_s27, 0  ;;  %s162_s26 = sand.u32 1, %s1434_s14  }
  0x32   : > { %s1092_s4 = sshll.u32 %s162_s26, 3  ;;  %s1093_s6 = sshll.u32 %s1442_s16, 7 }
  0x33   : > { %s1595_s5 = scalar_select %p37_p11, %s1434_s14, %s39_s25  }
  0x34   : > { %s1601_s9 = scalar_lea.hbm %s1774_s0, %s1093_s6  ;;  %s166_s21 = scalar_lea.vmem [#allocation2], %s1092_s4 }
  0x35   : > { %s173_s10 = sshll.u32 %s166_s21, 4  ;;  %p1607_p13 = pnand %p1215_p12, %p1580_p6  ;;  %s1603_s10 = int_to_ptr.vmem [resolvable:$true] %s173_s10 }
  0x36   : > { %s163_s18 = scalar_lea.sflag [#allocation3], %s162_s26  ;;  %s1330_s19 = scalar_lea.hbm %s1601_s9, 128 }
  0x37   : > { %p1331_p0 = scmp.ne.s32.totalorder %s1601_s9, %s1330_s19  ;;  %p1332_p3 = pneg %p1607_p13 }
  0x38   : > { %s1335_s4 = scalar_lea.hbm %s1774_s0, 256  ;;  %p1336_p9 = scmp.lt.u32.totalorder %s1601_s9, %s1774_s0 }
  0x39   : > { %p1333_p5 = pnand %p1332_p3, %p1331_p0  ;;  %p1337_p1 = scmp.lt.u32.totalorder %s1335_s4, %s1330_s19 }
  0x3a   : > { %p1339_p4 = scmp.lt.u32.totalorder %s1330_s19, %s1601_s9 }
  0x3b   : > { %p1334_p7 = pneg %p1333_p5  ;;  %p1338_p2 = por %p1337_p1, %p1336_p9 }
  0x3d   : > { %p1340_p6 = por %p1339_p4, %p1338_p2 }
  0x3f   : > { %p1341_p8 = pnand %p1340_p6, %p1334_p7 }
  0x41   : > { %1344 = shalt.err (!%p1341_p8)
}
  0x42   : > { %s1345_s26 = scalar_lea.vmem %s1603_s10, 128  ;;  %s1451_s7 = smov [#allocation2]  }
  0x43   : > { %p1346_p12 = scmp.ne.s32.totalorder %s1603_s10, %s1345_s26  ;;  %s1350_s8 = sshll.u32 %s1451_s7, 4  ;;  %s1351_s8 = int_to_ptr.vmem [resolvable:$false] %s1350_s8 }
  0x44   : > { %s1352_s21 = scalar_lea.vmem %s1351_s8, 256  ;;  %p1353_p5 = scmp.lt.s32.totalorder %s1603_s10, %s1351_s8 }
  0x45   : > { %p1348_p11 = pnand %p1346_p12, %p1332_p3  ;;  %p1354_p9 = scmp.lt.s32.totalorder %s1352_s21, %s1345_s26 }
  0x47   : > { %p1349_p0 = pneg %p1348_p11  ;;  %p1355_p1 = por %p1354_p9, %p1353_p5 }
  0x49   : > { %p1356_p2 = pnand %p1355_p1, %p1349_p0 }
  0x4b   : > { %1359 = shalt.err (!%p1356_p2)
}
  0x4c   : > { %1209 = dma.hbm_to_vmem [thread:$0]  (!%p1607_p13), %s1601_s9, 128, %s1603_s10, %s163_s18  }
  0x4d   : > { %p1792_p7 = scmp.ne.s32.totalorder %s1786_s24, 0 }
  0x4e   : > { %s1639_s19 = sand.u32 (!%p1792_p7), 1, %s1430_s13   ;;  %p1793_p3 = scmp.ne.s32.totalorder (!%p1792_p7), %s1784_s22, 0 }
  0x4f   : > { %182 = sbr.rel (%p1792_p7) target bundleno = 1360 (0x550), region = 32  ;;  %s1095_s25 = sshll.u32 (!%p1792_p7), %s1639_s19, 3 }
  0x50   : > { %s185_s27 = scalar_lea.sflag (!%p1792_p7), [#allocation3], %s1639_s19  ;;  %s188_s4 = scalar_lea.vmem (!%p1792_p7), [#allocation2], %s1095_s25 }
  0x56   : > { %1413 = dma.done.wait (%p1793_p3), %s185_s27, 128  }
  0x57   : > { %1415 = vsyncadd (%p1793_p3), %s185_s27, 4294967168  ;;  %p1794_p13 = scmp.ne.s32.totalorder %s1782_s20, 0 }
  0x59   : > { %1417 = dma.done.wait (%p1794_p13), [#allocation6], 512  }
  0x5a   : > { %1419 = vsyncadd (%p1794_p13), [#allocation6], 4294966784  ;;  %v1452_v0 = vmov 0.0|0.0   ;;  %vm1453_vm0 = vmmov 0   ;;  %v1454_v1 = vmov 0.0   ;;  %v216_v2 = vld [vmem:[#allocation5] sm:$0xff] }
  0x5b   : > { %1188 = vmatprep.subr.bf16.mxu0 %v1452_v0  ;;  %1145 = vmatprep.mubr.msk.f32.mxu0 %vm1453_vm0, %v1454_v1  ;;  %v217_v3 = vld [vmem:[#allocation5 + $0x8] sm:$0xff]  ;;  %v218_v4 = vld [vmem:[#allocation5 + $0x10] sm:$0xff]  ;;  %v219_v6 = vld [vmem:[#allocation5 + $0x18] sm:$0xff]  ;;  %vm227_vm1 = vcmask 261120   ;;  %s1455_s24 = smov 120   ;;  %s1456_s9 = smov 96  }
  0x5c   : > { %1148 = vmatprep.subr.mxu1 %v1454_v1  ;;  %1150 = vmatprep.mubr.msk.f32.mxu1 %vm1453_vm0, %v1454_v1  ;;  %v1189_v5 = vpack.c.bf16 %v217_v3, %v216_v2  ;;  %v1192_v7 = vpack.c.bf16 %v219_v6, %v218_v4  ;;  %v215_v8 = vld [vmem:[%s188_s4] sm:$0xff]  ;;  %s1457_s10 = smov 80   ;;  %s1458_s11 = smov 88   ;;  %vm304_vm2 = vcmask 64512   ;;  %vm978_vm3 = vcmask 130048  }
  0x5d   : > { %v1098_v9 = vld [vmem:[%s1776_s2] ss:$0 sm:$0xff]  ;;  %s1459_s18 = smov 72   ;;  %s1460_s29 = smov 112   ;;  %vm980_vm4 = vcmask 195584  }
  0x5e   : > { %1190 = vmatpush3.bf16.msra.mxu0 %v1189_v5  ;;  %s1461_s6 = smov 104   ;;  %s1462_s26 = smov 56  }
  0x5f   : > { %1191 = vmatprep.subr.bf16.mxu0 %v1452_v0  ;;  %s1463_s7 = smov 64   ;;  %s1464_s8 = smov 48  }
  0x60   : > { %s1465_s21 = smov 40   ;;  %s1466_s27 = smov 8  }
  0x61   : > { %s1467_s4 = smov 16   ;;  %s1468_s20 = smov 24  }
  0x62   : > { %1193 = vmatpush3.bf16.msra.mxu0 %v1192_v7  ;;  %s1113_s22 = sshll.u32 %s1438_s15, 7  ;;  %s984_s15 = scalar_lea.sflag [#allocation4], %s1639_s19 }
  0x63   : > { %1158 = vmatprep.subr.mxu0 %v1454_v1 }
  0x65   : > { %1146 = vmatmul.mubr.msk.f32.vlgmr.msra.gmra.mrb[0].mxu0 %vm227_vm1, %v215_v8 }
  0x66   : > { %1160 = vmatprep.mubr.msk.f32.mxu0 %vm1453_vm0, %v1454_v1 }
 0x138   : > { %v297_v10 = vpop.f32.mrb[0].mxu0 }
 0x139   : > { %v1665_v11 = vadd.f32 %v1098_v9, %v297_v10  ;;  %v1147_v12 = vpop.f32.mrb[1].mxu0 }
 0x13b   : > { %467 = vrot.lane.b32.xlu1 %v1665_v11, %s1455_s24  ;;  %302 = vrot.lane.b32.xlu0 %v1665_v11, %s1456_s9  ;;  %s214_s24 = scalar_lea.vmem [#allocation7], %s1095_s25 }
 0x13c   : > { %s998_s9 = sshll.u32 %s214_s24, 4  ;;  %s1726_s9 = int_to_ptr.vmem [resolvable:$true] %s998_s9 }
 0x13d   : > { %s1360_s25 = scalar_lea.vmem %s1726_s9, 128 }
 0x13e   : > { %p1361_p4 = scmp.ne.s32.totalorder %s1726_s9, %s1360_s25 }
 0x13f   : > { %635 = vrot.lane.b32.xlu1 %v1665_v11, %s1457_s10  ;;  %469 = vrot.lane.b32.xlu0 %v1665_v11, %s1458_s11 }
 0x140   : > { %p1362_p6 = pnand %p1361_p4, %p1586_p10 }
 0x142   : > { %p1363_p8 = pneg %p1362_p6 }
 0x143   : > { %801 = vrot.lane.b32.xlu1 %v1665_v11, %s1459_s18  ;;  %633 = vrot.lane.b32.xlu0 %v1665_v11, %s1460_s29  ;;  %s1724_s18 = scalar_lea.hbm %s1777_s3, %s1113_s22  ;;  %s1469_s29 = smov [#allocation7]  }
 0x147   : > { %799 = vrot.lane.b32.xlu0 %v1665_v11, %s1461_s6  ;;  %s1364_s6 = sshll.u32 %s1469_s29, 4  ;;  %s1365_s6 = int_to_ptr.vmem [resolvable:$false] %s1364_s6 }
 0x148   : > { %p1367_p12 = scmp.lt.s32.totalorder %s1726_s9, %s1365_s6 }
 0x1ad   : > { %v468_v13 = vpop.permute.xlu1 %467  ;;  %v303_v14 = vpop.permute.xlu0 %302 }
 0x1ae   : > { %1149 = vmatpush3.xpose.msk.msra.mxu1 %vm304_vm2, %v303_v14 }
 0x1af   : > { %1153 = vmatprep.subr.mxu1 %v1454_v1 }
 0x1b1   : > { %1151 = vmatmul.mubr.msk.f32.vlgmr.msra.gmra.mrb[0].mxu1 %vm304_vm2, %v1665_v11  ;;  %v470_v15 = vpop.permute.xlu0 %469  ;;  %v636_v16 = vpop.permute.xlu1 %635 }
 0x1b2   : > { %1159 = vmatpush3.xpose.msk.msra.mxu0 %vm304_vm2, %v470_v15  ;;  %1155 = vmatprep.mubr.msk.f32.mxu1 %vm1453_vm0, %v1454_v1 }
 0x1b3   : > { %1168 = vmatprep.subr.mxu0 %v1454_v1 }
 0x1b5   : > { %1161 = vmatmul.mubr.msk.f32.vlgmr.msra.gmra.mrb[2].mxu0 %vm304_vm2, %v468_v13  ;;  %v634_v17 = vpop.permute.xlu0 %633  ;;  %v802_v18 = vpop.permute.xlu1 %801 }
 0x1b6   : > { %1169 = vmatpush3.xpose.msk.msra.mxu0 %vm304_vm2, %v636_v16  ;;  %1170 = vmatprep.mubr.msk.f32.mxu0 %vm1453_vm0, %v1454_v1 }
 0x1b7   : > { %1178 = vmatprep.subr.mxu0 %v1454_v1 }
 0x1b9   : > { %1171 = vmatmul.mubr.msk.f32.vlgmr.msra.gmra.mrb[4].mxu0 %vm304_vm2, %v634_v17  ;;  %v800_v19 = vpop.permute.xlu0 %799 }
 0x1ba   : > { %1179 = vmatpush3.xpose.msk.msra.mxu0 %vm304_vm2, %v802_v18  ;;  %1180 = vmatprep.mubr.msk.f32.mxu0 %vm1453_vm0, %v1454_v1 }
 0x1bd   : > { %1181 = vmatmul.mubr.msk.f32.vlgmr.msra.gmra.mrb[6].mxu0 %vm304_vm2, %v800_v19 }
 0x284   : > { %v375_v20 = vpop.f32.mrb[0].mxu1 }
 0x285   : > { %v379_v21 = vmul.f32 0.35355338, %v375_v20  ;;  %v1152_v22 = vpop.f32.mrb[1].mxu1 }
 0x287   : > { %v380_v23 = vsel %vm304_vm2, %v379_v21, -inf }
 0x288   : > { %381 = vmax.xlane.f32.xlu1 %v380_v23  ;;  %v541_v24 = vpop.f32.mrb[2].mxu0 }
 0x289   : > { %v545_v25 = vmul.f32 0.35355338, %v541_v24  ;;  %v1162_v26 = vpop.f32.mrb[3].mxu0 }
 0x28b   : > { %v546_v27 = vsel %vm304_vm2, %v545_v25, -inf }
 0x28c   : > { %547 = vmax.xlane.f32.xlu0 %v546_v27  ;;  %v707_v28 = vpop.f32.mrb[4].mxu0 }
 0x28d   : > { %v711_v29 = vmul.f32 0.35355338, %v707_v28  ;;  %v1172_v30 = vpop.f32.mrb[5].mxu0 }
 0x28f   : > { %v712_v31 = vsel %vm304_vm2, %v711_v29, -inf }
 0x290   : > { %713 = vmax.xlane.f32.xlu0 %v712_v31  ;;  %v873_v32 = vpop.f32.mrb[6].mxu0 }
 0x291   : > { %v877_v33 = vmul.f32 0.35355338, %v873_v32  ;;  %v1182_v34 = vpop.f32.mrb[7].mxu0 }
 0x293   : > { %v878_v35 = vsel %vm304_vm2, %v877_v33, -inf }
 0x294   : > { %879 = vmax.xlane.f32.xlu1 %v878_v35 }
 0x2a5   : > { %557 = vrot.lane.b32.xlu1 %v1665_v11, %s1462_s26  ;;  %s1366_s26 = scalar_lea.vmem %s1365_s6, 256 }
 0x2a6   : > { %p1368_p11 = scmp.lt.s32.totalorder %s1366_s26, %s1360_s25 }
 0x2a8   : > { %p1369_p0 = por %p1368_p11, %p1367_p12 }
 0x2aa   : > { %p1370_p5 = pnand %p1369_p0, %p1363_p8 }
 0x315   : > { %v382_v36 = vpop.xlane.xlu1 %381 }
 0x316   : > { %v383_v37 = vsub.f32 %v379_v21, %v382_v36 }
 0x318   : > { %v384_v38 = vmul.f32 1.442695, %v383_v37 }
 0x319   : > { %v548_v39 = vpop.xlane.xlu0 %547 }
 0x31a   : > { %1286 = vpow2.f32 %v384_v38  ;;  %v549_v40 = vsub.f32 %v545_v25, %v548_v39 }
 0x31c   : > { %v550_v41 = vmul.f32 1.442695, %v549_v40 }
 0x31d   : > { %v714_v51 = vpop.xlane.xlu0 %713 }
 0x31e   : > { %1288 = vpow2.f32 %v550_v41  ;;  %v715_v52 = vsub.f32 %v711_v29, %v714_v51 }
 0x320   : > { %v716_v53 = vmul.f32 1.442695, %v715_v52 }
 0x321   : > { %v880_v42 = vpop.xlane.xlu1 %879 }
 0x322   : > { %v881_v43 = vsub.f32 %v877_v33, %v880_v42 }
 0x324   : > { %v1287_v44 = vpop.eup %1286  ;;  %v882_v45 = vmul.f32 1.442695, %v881_v43 }
 0x325   : > { %v386_v46 = vsel %vm304_vm2, %v1287_v44, 0.0  ;;  %v558_v56 = vpop.permute.xlu1 %557 }
 0x326   : > { %1290 = vpow2.f32 %v882_v45  ;;  %387 = vadd.xlane.f32.xlu0 %v386_v46 }
 0x327   : > { %1292 = vpow2.f32 %v716_v53 }
 0x328   : > { %v1289_v47 = vpop.eup %1288 }
 0x329   : > { %v552_v48 = vsel %vm304_vm2, %v1289_v47, 0.0 }
 0x32a   : > { %553 = vadd.xlane.f32.xlu1 %v552_v48 }
 0x330   : > { %v1291_v49 = vpop.eup %1290 }
 0x331   : > { %v884_v50 = vsel %vm304_vm2, %v1291_v49, 0.0  ;;  %v1293_v54 = vpop.eup %1292 }
 0x332   : > { %885 = vadd.xlane.f32.xlu1 %v884_v50  ;;  %v718_v55 = vsel %vm304_vm2, %v1293_v54, 0.0 }
 0x33c   : > { %391 = vrot.lane.b32.xlu0 %v1665_v11, %s1463_s7 }
 0x343   : > { %723 = vrot.lane.b32.xlu1 %v1665_v11, %s1464_s8 }
 0x35b   : > { %719 = vadd.xlane.f32.xlu0 %v718_v55 }
 0x371   : > { %889 = vrot.lane.b32.xlu0 %v1665_v11, %s1465_s21 }
 0x3b3   : > { %v388_v57 = vpop.xlane.xlu0 %387 }
 0x3b4   : > { %1294 = vrcp.f32 %v388_v57 }
 0x3b7   : > { %v392_v58 = vpop.permute.xlu0 %391  ;;  %v554_v59 = vpop.xlane.xlu1 %553 }
 0x3b8   : > { %1296 = vrcp.f32 %v554_v59  ;;  %1154 = vmatpush3.msra.mxu1 %v392_v58 }
 0x3b9   : > { %1163 = vmatprep.subr.mxu1 %v1454_v1 }
 0x3be   : > { %v1295_v60 = vpop.eup %1294 }
 0x3bf   : > { %v390_v61 = vmul.f32 %v1295_v60, %v1287_v44  ;;  %v886_v62 = vpop.xlane.xlu1 %885 }
 0x3c1   : > { %1156 = vmatmul.mubr.msk.f32.vlgmr.msra.gmra.mrb[2].mxu1 %vm304_vm2, %v390_v61 }
 0x3c2   : > { %v1297_v63 = vpop.eup %1296  ;;  %1164 = vmatpush3.msra.mxu1 %v558_v56  ;;  %1165 = vmatprep.mubr.msk.f32.mxu1 %vm1453_vm0, %v1454_v1 }
 0x3c3   : > { %v556_v0 = vmul.f32 %v1297_v63, %v1289_v47  ;;  %v724_v2 = vpop.permute.xlu1 %723  ;;  %1173 = vmatprep.subr.mxu1 %v1454_v1 }
 0x3c5   : > { %1166 = vmatmul.mubr.msk.f32.vlgmr.msra.gmra.mrb[4].mxu1 %vm304_vm2, %v556_v0 }
 0x3c6   : > { %1174 = vmatpush3.msra.mxu1 %v724_v2  ;;  %1175 = vmatprep.mubr.msk.f32.mxu1 %vm1453_vm0, %v1454_v1 }
 0x3c7   : > { %1183 = vmatprep.subr.mxu1 %v1454_v1 }
 0x3e8   : > { %v720_v3 = vpop.xlane.xlu0 %719 }
 0x3e9   : > { %1298 = vrcp.f32 %v720_v3 }
 0x3ea   : > { %1300 = vrcp.f32 %v886_v62 }
 0x3ec   : > { %v890_v7 = vpop.permute.xlu0 %889 }
 0x3f3   : > { %v1299_v4 = vpop.eup %1298 }
 0x3f4   : > { %v722_v5 = vmul.f32 %v1299_v4, %v1293_v54  ;;  %v1301_v6 = vpop.eup %1300 }
 0x3f5   : > { %v888_v8 = vmul.f32 %v1301_v6, %v1291_v49 }
 0x3f6   : > { %1176 = vmatmul.mubr.msk.f32.vlgmr.msra.gmra.mrb[6].mxu1 %vm304_vm2, %v722_v5 }
 0x3f7   : > { %1184 = vmatpush3.msra.mxu1 %v890_v7  ;;  %1185 = vmatprep.mubr.msk.f32.mxu1 %vm1453_vm0, %v1454_v1 }
 0x3fa   : > { %1186 = vmatmul.mubr.msk.f32.vlgmr.msra.gmra.mrb[8].mxu1 %vm304_vm2, %v888_v8 }
 0x494   : > { %v463_v9 = vpop.f32.mrb[2].mxu1 }
 0x495   : > { %v1157_v10 = vpop.f32.mrb[3].mxu1 }
 0x498   : > { %v629_v11 = vpop.f32.mrb[4].mxu1 }
 0x499   : > { %966 = vrot.lane.b32.xlu1 %v629_v11, %s1466_s27  ;;  %v1167_v12 = vpop.f32.mrb[5].mxu1 }
 0x4c9   : > { %v795_v13 = vpop.f32.mrb[6].mxu1 }
 0x4ca   : > { %970 = vrot.lane.b32.xlu0 %v795_v13, %s1467_s4  ;;  %v1177_v14 = vpop.f32.mrb[7].mxu1 }
 0x4cd   : > { %v961_v15 = vpop.f32.mrb[8].mxu1 }
 0x4ce   : > { %974 = vrot.lane.b32.xlu1 %v961_v15, %s1468_s20  ;;  %v1187_v1 = vpop.f32.mrb[9].mxu1 }
 0x50b   : > { %v967_v16 = vpop.permute.xlu1 %966 }
 0x50c   : > { %v977_v18 = vsel %vm304_vm2, %v463_v9, %v967_v16 }
 0x53c   : > { %v971_v17 = vpop.permute.xlu0 %970 }
 0x53d   : > { %v979_v19 = vsel %vm978_vm3, %v977_v18, %v971_v17 }
 0x540   : > { %v975_v20 = vpop.permute.xlu1 %974 }
 0x541   : > { %v981_v21 = vsel %vm980_vm4, %v979_v19, %v975_v20 }
 0x542   : > { %982 = vst.msk [vmem:[%s214_s24] sm:$0xff] %vm227_vm1, %v981_v21 }
 0x543   : > { %1373 = shalt.err (!%p1370_p5)
}
 0x544   : > { %s1374_s19 = scalar_lea.hbm %s1724_s18, 128  ;;  %s1378_s21 = scalar_lea.hbm %s1777_s3, 256 }
 0x545   : > { %p1375_p9 = scmp.ne.s32.totalorder %s1724_s18, %s1374_s19  ;;  %p1379_p7 = scmp.lt.u32.totalorder %s1724_s18, %s1777_s3 }
 0x546   : > { %p1380_p3 = scmp.lt.u32.totalorder %s1378_s21, %s1374_s19  ;;  %p1382_p4 = scmp.lt.u32.totalorder %s1374_s19, %s1724_s18 }
 0x547   : > { %p1376_p1 = pnand %p1375_p9, %p1586_p10 }
 0x548   : > { %p1381_p13 = por %p1380_p3, %p1379_p7 }
 0x549   : > { %p1377_p2 = pneg %p1376_p1 }
 0x54a   : > { %p1383_p6 = por %p1382_p4, %p1381_p13 }
 0x54c   : > { %p1384_p8 = pnand %p1383_p6, %p1377_p2 }
 0x54e   : > { %1387 = shalt.err (!%p1384_p8)
}
 0x54f   : > { %1200 = dma.vmem_to_hbm [thread:$0]  (%p1586_p10), %s1726_s9, 128, %s1724_s18, %s984_s15  }
 0x550 PF: > { %s1010_s20 = sand.u32 1, %s1426_s12   ;;  %p1795_p12 = scmp.ne.s32.totalorder %s1785_s23, 0 }
 0x551   : > { %p1796_p11 = scmp.ge.s32.totalorder %s1446_s17, 2  ;;  %s1011_s22 = scalar_lea.sflag [#allocation4], %s1010_s20 }
 0x553   : > { %p1211_p0 = pnand %p1796_p11, %p1795_p12 }
 0x555   : > { %1421 = dma.done.wait (!%p1211_p0), %s1011_s22, 128  }
 0x556   : > { %1423 = vsyncadd (!%p1211_p0), %s1011_s22, 4294967168  ;;  %s20_s17 = sadd.s32 1, %s1446_s17   ;;  %s1797_s12 = smov %s1430_s13 }
 0x557   : > { %p17_p5 = scmp.ge.s32.totalorder %s20_s17, 4   ;;  %s1798_s13 = smov %s1434_s14 }
 0x558   : > { %s1799_s14 = smov %s1595_s5  ;;  %s1800_s15 = smov %s1442_s16 }
 0x559   : > { %s1801_s16 = smov %s1803_s28  ;;  %19 = sbr.rel (!%p17_p5) target bundleno = 7 (0x7), region = 81 }
 0x560   :  { %1016 = vsyncpa [#allocation3], 1 }
 0x561   :  { %1018 = vsyncpa [#allocation3 + $0x1], 1 }
 0x562   :  { %1019 = vsyncpa [#allocation6], 1 }
 0x563   :  { %1020 = vsyncpa [#allocation4], 1 }
 0x564   :  { %1022 = vsyncpa [#allocation4 + $0x1], 1 }

</bundles_post_ra>
